<compile_context>
chip_gen: v6e
topology: v6e:2x2x1
jax: 0.10.0
libtpu: 0.0.40
codegen_flags: <defaults>
</compile_context>

<pallas_src>
import jax
import jax.numpy as jnp
from jax.experimental import pallas as pl
from jax.experimental.pallas import tpu as pltpu


def _lambda_silu_kernel(x_ref, o_ref):
    xf = x_ref[...].astype(jnp.float32)
    # fn(x) = x * sigmoid(x).  exp lands on the EUP; the only VALU work per
    # element is one add and two muls.  Exact reciprocal keeps numerics within
    # float ulps of jax.nn.sigmoid (approx=True would land on the EUP too but
    # costs ~1e-4 relative error).
    e = jnp.exp(-xf)
    o_ref[...] = (xf * pl.reciprocal(1.0 + e, approx=False)).astype(o_ref.dtype)


def _pick_lanes(n: int, sub_mult: int):
    """Widest lane count from the ladder that divides n, preferring >= sub_mult rows."""
    best = None
    for cand in (4096, 2048, 1024, 512, 256, 128):
        if n % cand == 0:
            if best is None:
                best = cand
            if n // cand >= sub_mult:
                return cand
    return best  # may be None if n is not a multiple of 128


def lambda_layer_forward(x: jax.Array, *, block_budget_bytes: int = 2 * 1024 * 1024) -> jax.Array:
    """Apply LambdaLayer(fn = x * sigmoid(x)) to a tensor of any shape via Pallas."""
    orig_shape = x.shape
    total = x.size
    itemsize = jnp.dtype(x.dtype).itemsize
    # Native packed-sublane tile height: 8 rows for 32-bit, 16 for bf16, 32 for int8/fp8.
    sub_mult = max(8, (8 * 4) // itemsize)

    # ---- choose a lane-dense 2-D view ---------------------------------------
    lanes = _pick_lanes(total, sub_mult)
    padded = False
    if lanes is None:
        # Not a multiple of 128: pad the flat view up to the native tile
        # alignment (<= sub_mult*128 - 1 extra elements) and slice afterwards.
        # Far cheaper than masked vst.msk stores over the whole tensor.
        align = sub_mult * 128
        work_total = ((total + align - 1) // align) * align
        flat = jnp.pad(x.reshape(-1), (0, work_total - total))
        lanes = _pick_lanes(work_total, sub_mult)
        padded = True
    else:
        work_total = total
        flat = x.reshape(-1)

    rows = work_total // lanes
    slab = flat.reshape(rows, lanes)

    # ---- byte-budgeted row tile ---------------------------------------------
    # Pipelined footprint = 2 arrays x 2 buffers x block; 2 MiB blocks -> 8 MiB,
    # inside every generation's default scoped VMEM (v5e 16, v6e/v7x 32 MiB).
    tr_budget = max(1, block_budget_bytes // (lanes * itemsize))
    if rows <= tr_budget or rows <= sub_mult:
        tr = rows                              # single full-extent block (exempt from (8,128))
    else:
        tr = min(tr_budget, rows)
        tr = max(sub_mult, (tr // sub_mult) * sub_mult)   # dtype-aware sublane rounding
    grid = (pl.cdiv(rows, tr),)                # ragged last block auto-masked by Pallas

    block_bytes = tr * lanes * itemsize
    pipeline_bytes = 2 * 2 * block_bytes
    vmem_limit = None
    if pipeline_bytes > 12 * 1024 * 1024:      # only needed if budget is raised past v5e default
        vmem_limit = min(64 << 20, pipeline_bytes + (4 << 20))

    cost = pl.CostEstimate(
        flops=3 * total,
        transcendentals=total,
        bytes_accessed=2 * total * itemsize,
    )

    out = pl.pallas_call(
        _lambda_silu_kernel,
        out_shape=jax.ShapeDtypeStruct((rows, lanes), x.dtype),
        grid_spec=pltpu.PrefetchScalarGridSpec(
            num_scalar_prefetch=0,
            grid=grid,
            in_specs=[pl.BlockSpec((tr, lanes), lambda i: (i, 0))],
            out_specs=pl.BlockSpec((tr, lanes), lambda i: (i, 0)),
        ),
        compiler_params=pltpu.CompilerParams(
            dimension_semantics=("parallel",),
            vmem_limit_bytes=vmem_limit,
        ),
        cost_estimate=cost,
    )(slab)

    if padded:
        return out.reshape(-1)[:total].reshape(orig_shape)
    return out.reshape(orig_shape)


if __name__ == "__main__":
    key = jax.random.PRNGKey(0)
    # Small NCHW input consistent with the module's conv-style usage.
    x = jax.random.normal(key, (2, 4, 16, 16), dtype=jnp.float32)

    y = lambda_layer_forward(x)
    y = jax.block_until_ready(y)

    # Reference check in plain JAX (same fn the LambdaLayer wraps).
    y_ref = x * jax.nn.sigmoid(x)
    assert y.shape == x.shape and y.dtype == x.dtype
    assert jnp.allclose(y, y_ref, atol=1e-5, rtol=1e-5)

    # Exercise the padded (non-128-divisible) fallback path once as well.
    x2 = jax.random.normal(jax.random.PRNGKey(1), (3, 5, 7), dtype=jnp.float32)
    y2 = jax.block_until_ready(lambda_layer_forward(x2))
    assert jnp.allclose(y2, x2 * jax.nn.sigmoid(x2), atol=1e-5, rtol=1e-5)

    print("KERNEL_OK")
</pallas_src>

<mosaic_0001>
module attributes {stable_mosaic.version = 11 : i64} {
  func.func @_lambda_silu_kernel(%arg0: i32, %arg1: memref<8x256xf32, #tpu.memory_space<vmem>>, %arg2: memref<8x256xf32, #tpu.memory_space<vmem>>) attributes {dimension_semantics = [#tpu.dimension_semantics<parallel>], iteration_bounds = array<i64: 1>, scalar_prefetch = 0 : i64, scratch_operands = 0 : i64, tpu.core_type = #tpu.core_type<tc>, window_params = [{transform_indices = @transform_0, window_bounds = array<i64: 8, 256>}, {transform_indices = @transform_1, window_bounds = array<i64: 8, 256>}]} {
    %c0 = arith.constant 0 : index
    %c0_0 = arith.constant 0 : index
    %0 = vector.load %arg1[%c0, %c0_0] : memref<8x256xf32, #tpu.memory_space<vmem>>, vector<8x256xf32>
    %cst = arith.constant 0.000000e+00 : f32
    %1 = vector.broadcast %cst : f32 to vector<8x256xf32>
    %2 = arith.subf %1, %0 : vector<8x256xf32>
    %3 = math.exp %2 : vector<8x256xf32>
    %cst_1 = arith.constant 1.000000e+00 : f32
    %4 = vector.broadcast %cst_1 : f32 to vector<8x256xf32>
    %5 = arith.addf %4, %3 : vector<8x256xf32>
    %6 = tpu.reciprocal %5 : vector<8x256xf32> -> vector<8x256xf32>
    %7 = arith.mulf %0, %6 : vector<8x256xf32>
    %c0_2 = arith.constant 0 : index
    %c0_3 = arith.constant 0 : index
    %8 = vector.load %arg2[%c0_2, %c0_3] : memref<8x256xf32, #tpu.memory_space<vmem>>, vector<8x256xf32>
    tpu.vector_store %arg2[%c0_2, %c0_3], %7 {strides = array<i32>} : memref<8x256xf32, #tpu.memory_space<vmem>>, vector<8x256xf32>,
    return
  }
  func.func @transform_0(%arg0: i32) -> (i32, i32) {
    %c0_i32 = arith.constant 0 : i32
    %c0_i32_0 = arith.constant 0 : i32
    return %arg0, %c0_i32 : i32, i32
  }
  func.func @transform_1(%arg0: i32) -> (i32, i32) {
    %c0_i32 = arith.constant 0 : i32
    %c0_i32_0 = arith.constant 0 : i32
    return %arg0, %c0_i32 : i32, i32
  }
}

</mosaic_0001>

<bundles_post_ra>
// kernel: tpu_custom_call.1
= control target key start
LH: loop header
LB: loop body
LE: loop exit
PB: predicated region body
PF: predicated region fallthrough
CT: control target
= control target key end

     0   :  { %6 = vsyncpa [#allocation3], 0  ;;  %s124_s0 = inlined_call_operand.hbm [shape: f32[8,256], index: 0, kind: input, shape index: {}]   ;;  %s125_s1 = inlined_call_operand.hbm [shape: f32[8,256], index: 1, kind: output, shape index: {}]  }
   0x1   :  { %7 = vsyncpa [#allocation4], 0  ;;  %s106_s6 = smov [#allocation2]  }
   0x2   :  { %s14_s7 = sshll.u32 %s106_s6, 4  ;;  %s15_s7 = int_to_ptr.vmem [resolvable:$true] %s14_s7 }
   0x3   :  { %s70_s8 = scalar_lea.vmem %s15_s7, 256  ;;  %p75_p1 = scmp.lt.s32.totalorder %s15_s7, %s15_s7 }
   0x4   :  { %p71_p0 = scmp.ne.s32.totalorder %s15_s7, %s70_s8  ;;  %p76_p2 = scmp.lt.s32.totalorder %s70_s8, %s70_s8 }
   0x6   :  { %p77_p3 = por %p76_p2, %p75_p1 }
   0x8   :  { %p78_p4 = pnand %p77_p3, %p71_p0 }
   0xa   :  { %81 = shalt.err (!%p78_p4)
}
   0xb   :  { %17 = dma.hbm_to_vmem [thread:$0]  %s124_s0, 256, %s15_s7, [#allocation3]  }
   0xc   :  { %102 = dma.done.wait [#allocation3], 256  }
   0xd   :  { %103 = vsyncadd [#allocation3], 4294967040  ;;  %v21_v0 = vld [vmem:[#allocation2] sm:$0xff]  ;;  %v22_v1 = vld [vmem:[#allocation2 + $0x8] sm:$0xff]  ;;  %s107_s11 = smov [#allocation5]  }
   0xe   :  { %v23_v2 = vsub.f32 0.0, %v21_v0  ;;  %v24_v3 = vsub.f32 0.0, %v22_v1  ;;  %s43_s12 = sshll.u32 %s107_s11, 4  ;;  %s44_s12 = int_to_ptr.vmem [resolvable:$true] %s43_s12 }
   0xf   :  { %s82_s0 = scalar_lea.vmem %s44_s12, 256  ;;  %p87_p6 = scmp.lt.s32.totalorder %s44_s12, %s44_s12 }
  0x10   :  { %v25_v4 = vmul.f32 1.442695, %v23_v2  ;;  %v27_v5 = vmul.f32 1.442695, %v24_v3  ;;  %p83_p5 = scmp.ne.s32.totalorder %s44_s12, %s82_s0  ;;  %p88_p7 = scmp.lt.s32.totalorder %s82_s0, %s82_s0 }
  0x12   :  { %54 = vpow2.f32 %v25_v4  ;;  %p89_p8 = por %p88_p7, %p87_p6 }
  0x13   :  { %56 = vpow2.f32 %v27_v5 }
  0x14   :  { %p90_p9 = pnand %p89_p8, %p83_p5 }
  0x1f   :  { %v55_v6 = vpop.eup %54 }
  0x20   :  { %v57_v7 = vpop.eup %56  ;;  %v29_v8 = vadd.f32 1.0, %v55_v6 }
  0x21   :  { %v30_v9 = vadd.f32 1.0, %v57_v7 }
  0x22   :  { %58 = vrcp.f32 %v29_v8 }
  0x23   :  { %60 = vrcp.f32 %v30_v9 }
  0x2f   :  { %v59_v10 = vpop.eup %58 }
  0x30   :  { %v61_v11 = vpop.eup %60  ;;  %v33_v12 = vmul.f32 %v59_v10, %v21_v0 }
  0x31   :  { %v34_v13 = vmul.f32 %v61_v11, %v22_v1 }
  0x32   :  { %35 = vst [vmem:[#allocation5] sm:$0xff] %v33_v12 }
  0x33   :  { %36 = vst [vmem:[#allocation5 + $0x8] sm:$0xff] %v34_v13 }
  0x34   :  { %93 = shalt.err (!%p90_p9)
}
  0x35   :  { %46 = dma.vmem_to_hbm [thread:$0]  %s44_s12, 256, %s125_s1, [#allocation4]  }
  0x36   :  { %104 = dma.done.wait [#allocation4], 256  }
  0x37   :  { %105 = vsyncadd [#allocation4], 4294967040 }
  0x38   :  { %50 = vsyncpa [#allocation3], 1 }
  0x39   :  { %51 = vsyncpa [#allocation4], 1 }

</bundles_post_ra>
